<compile_context>
chip_gen: v7x
topology: tpu7x:2x2x1
jax: 0.10.0
libtpu: 0.0.40
codegen_flags: <defaults>
</compile_context>

<pallas_src>
import numpy as np
import jax
import jax.numpy as jnp
from jax.experimental import pallas as pl
from jax.experimental.pallas import tpu as pltpu


# ------------------------------------------------------------------ kernel --

def _spec_kernel(frames_ref, basis_ref, out_ref):
    # frames: (tm, n_fft); basis: (n_fft, fc+fs) = [cos(+Nyq+pad) | sin(+pad)];
    # out: (tm, fc).  nnAudio 'Complex' output stacks (real, -imag); the sign
    # cancels in real^2 + imag^2, so squaring the +sin projection is identical.
    fc = out_ref.shape[1]
    fs = basis_ref.shape[1] - fc
    res = jnp.dot(frames_ref[...], basis_ref[...],
                  preferred_element_type=jnp.float32)
    c = res[:, :fc]
    s = res[:, fc:]
    if fs == fc:
        out_ref[...] = c * c + s * s
    else:
        # sin half is 128 lanes narrower (Nyquist sin == 0); both stores stay
        # lane-aligned so no concat / relayout is needed.
        out_ref[:, :fs] = c[:, :fs] * c[:, :fs] + s * s
        out_ref[:, fs:] = c[:, fs:] * c[:, fs:]


# ----------------------------------------------------------------- helpers --

def _hann_periodic(n_fft):
    n = np.arange(n_fft, dtype=np.float64)
    return 0.5 - 0.5 * np.cos(2.0 * np.pi * n / n_fft)


def _fourier_basis(n_fft, freq_bins):
    """Windowed Fourier kernels identical to nnAudio's create_fourier_kernels
    (window='hann' periodic, win_length=n_fft, freq_scale='no')."""
    n = np.arange(n_fft, dtype=np.float64)
    window = _hann_periodic(n_fft)
    k = np.arange(freq_bins, dtype=np.float64)
    ang = 2.0 * np.pi * np.outer(n, k) / n_fft            # (n_fft, F)
    return window[:, None] * np.cos(ang), window[:, None] * np.sin(ang)


def _num_tensorcores():
    """2 TensorCores per chip on v7x, 1 on v5e/v6e."""
    try:
        kind = jax.devices()[0].device_kind.lower()
        if "v7" in kind:
            return 2
    except Exception:
        pass
    return 1


def _vmem_budget_bytes():
    """Generation-aware VMEM budget: ~7/8 of physical capacity (56 MiB on v7x,
    112 MiB on v5e/v6e), leaving Mosaic internal-scratch headroom."""
    try:
        cap = int(pltpu.get_tpu_info().vmem_capacity_bytes)
        if cap > 0:
            return (cap * 7) // 8
    except Exception:
        pass
    return 48 << 20                       # conservative: fits every generation


def _choose_tm(M, tm, compute_dtype, num_cores):
    """Frame-tile size: sublane multiple per dtype packing (16 for bf16, 8 for
    f32); only force >=2 grid steps for small M when the part has 2 TCs."""
    sub = 16 if jnp.dtype(compute_dtype).itemsize < 4 else 8
    m_up = -(-M // sub) * sub
    tm = min(int(tm), m_up)
    if num_cores >= 2 and M > sub:
        tm = min(tm, -(-M // num_cores))
    return max(sub, -(-tm // sub) * sub)


def _plan_freq_tiling(n_fft, F, tm, itemsize, budget, freq_tiles=None):
    """Pick (f_tiles, fc, fs): per-tile cos/sin column counts (lane multiples)
    so that the single-buffered basis tile + frames/output/result fit the VMEM
    budget.  f_tiles == 1 keeps the asymmetric (cos = sin + 128) layout."""
    lanes = -(-F // 128)                               # lane groups for cos incl. Nyquist
    fs_single = -(-(n_fft // 2) // 128) * 128
    candidates = [freq_tiles] if freq_tiles else range(1, lanes + 1)
    for f_tiles in candidates:
        f_tiles = max(1, min(int(f_tiles), lanes))
        if f_tiles == 1:
            fc, fs = lanes * 128, fs_single
        else:
            fc = fs = (-(-lanes // f_tiles)) * 128
        width = fc + fs
        need = (2 * tm * n_fft * itemsize              # frames (double-buffered)
                + n_fft * width * itemsize             # basis  (single-buffered)
                + 2 * tm * fc * 4                      # output (double-buffered)
                + tm * width * 4                       # f32 matmul result
                + tm * fc * 4)                         # epilogue temporaries
        if freq_tiles or need + (2 << 20) <= budget or f_tiles == lanes:
            return f_tiles, fc, fs, need
    return lanes, 128, 128, 0                          # unreachable


def _build_basis(n_fft, F, f_tiles, fc, fs, dtype):
    """Fused basis laid out as per-freq-tile column blocks [cos_j | sin_j]."""
    cos_b, sin_b = _fourier_basis(n_fft, F)
    cos_p = np.zeros((n_fft, f_tiles * fc))
    cos_p[:, :F] = cos_b
    sin_p = np.zeros((n_fft, f_tiles * fs))
    n_sin = min(F, f_tiles * fs)
    sin_p[:, :n_sin] = sin_b[:, :n_sin]
    blocks = []
    for j in range(f_tiles):
        blocks.append(cos_p[:, j * fc:(j + 1) * fc])
        blocks.append(sin_p[:, j * fs:(j + 1) * fs])
    return jnp.asarray(np.concatenate(blocks, axis=1), dtype=dtype)


# ----------------------------------------------------------------- forward --

def spec_forward(audio, n_fft=2048, hop_length=1024, power=2, tm=256,
                 compute_dtype=jnp.bfloat16, freq_tiles=None, freq_first=True):
    """Pallas implementation of Spec.forward (nnAudio STFT with window='hann',
    win_length=n_fft, center=False, freq_scale='no', output_format='Complex';
    amp() and optional sqrt).  center=False makes pad_mode irrelevant.

    compute_dtype=jnp.bfloat16 is the MXU fast path (2-4x on v5e/v6e/v7x, f32
    accumulation); pass jnp.float32 when bit-accurate small power values matter.
    """
    audio = audio.astype(jnp.float32)
    B, L = audio.shape
    T = (L - n_fft) // hop_length + 1            # center=False framing
    F = n_fft // 2 + 1                           # freq bins incl. Nyquist
    M = B * T

    num_cores = _num_tensorcores()
    itemsize = int(jnp.dtype(compute_dtype).itemsize)
    budget = _vmem_budget_bytes()

    tm = _choose_tm(M, tm, compute_dtype, num_cores)
    M_pad = pl.cdiv(M, tm) * tm

    f_tiles, fc, fs, vmem_need = _plan_freq_tiling(
        n_fft, F, tm, itemsize, budget, freq_tiles)
    width = fc + fs
    basis = _build_basis(n_fft, F, f_tiles, fc, fs, compute_dtype)

    # Frame the signal: frames[b, t, n] = audio[b, t*hop + n]
    # TODO(synk): framing stays a host-side XLA gather; an in-kernel overlapping
    # window DMA (audio via memory_space=pl.ANY + per-tile span copies) would cut
    # input HBM traffic by ~n_fft/hop, but frame tiles crossing batch rows make
    # the contiguous-span DMA awkward.
    idx = jnp.arange(T)[:, None] * hop_length + jnp.arange(n_fft)[None, :]
    frames = audio[:, idx].reshape(M, n_fft)                        # (M, n_fft)
    frames_k = jnp.pad(frames, ((0, M_pad - M), (0, 0))).astype(compute_dtype)

    flops = 2 * M_pad * f_tiles * n_fft * width + 3 * M_pad * f_tiles * fc
    bytes_accessed = (f_tiles * M_pad * n_fft * itemsize
                      + n_fft * f_tiles * width * itemsize
                      + M_pad * f_tiles * fc * 4)
    vmem_limit = int(min(max(vmem_need + (4 << 20), 16 << 20), budget))

    try:
        # Grid-invariant along the frame axis -> single buffer saves half the
        # basis VMEM with zero perf cost.
        basis_spec = pl.BlockSpec((n_fft, width), lambda j, i: (0, j),
                                  pipeline_mode=pl.Buffered(1))
    except TypeError:       # very old jax: fall back to default double-buffering
        basis_spec = pl.BlockSpec((n_fft, width), lambda j, i: (0, j))

    power_main = pl.pallas_call(
        _spec_kernel,
        out_shape=jax.ShapeDtypeStruct((M_pad, f_tiles * fc), jnp.float32),
        grid_spec=pltpu.PrefetchScalarGridSpec(
            num_scalar_prefetch=0,
            grid=(f_tiles, M_pad // tm),     # freq outermost: basis tile resident
            in_specs=[
                pl.BlockSpec((tm, n_fft), lambda j, i: (i, 0)),
                basis_spec,
            ],
            out_specs=pl.BlockSpec((tm, fc), lambda j, i: (i, j)),
        ),
        compiler_params=pltpu.CompilerParams(
            dimension_semantics=("parallel", "parallel"),
            vmem_limit_bytes=vmem_limit),
        cost_estimate=pl.CostEstimate(
            flops=flops, transcendentals=0, bytes_accessed=bytes_accessed),
    )(frames_k, basis)

    power_flat = power_main[:M, :F]
    power_spec = power_flat.reshape(B, T, F)
    if freq_first:
        # PyTorch/nnAudio layout (batch, freq_bins, time).  Consumers that
        # accept (B, T, F) can pass freq_first=False and skip this HBM pass.
        power_spec = power_spec.transpose(0, 2, 1)

    if power == 2:
        return power_spec
    elif power == 1:
        return jnp.sqrt(jnp.clip(power_spec, 1e-8))
    raise ValueError("power must be 1 or 2")


# --------------------------------------------------------------- reference --

def _spec_reference(audio, n_fft, hop_length, power):
    """Pure-JAX (f32) reference mirroring the PyTorch module semantics."""
    audio = audio.astype(jnp.float32)
    B, L = audio.shape
    T = (L - n_fft) // hop_length + 1
    F = n_fft // 2 + 1
    cos_b, sin_b = _fourier_basis(n_fft, F)
    cos_b = jnp.asarray(cos_b, dtype=jnp.float32)
    sin_b = jnp.asarray(sin_b, dtype=jnp.float32)
    idx = jnp.arange(T)[:, None] * hop_length + jnp.arange(n_fft)[None, :]
    frames = audio[:, idx]                                          # (B, T, n_fft)
    real = jnp.einsum('btn,nf->btf', frames, cos_b)
    imag = jnp.einsum('btn,nf->btf', frames, sin_b)
    ps = (real ** 2 + imag ** 2).transpose(0, 2, 1)
    if power == 2:
        return ps
    return jnp.sqrt(jnp.clip(ps, 1e-8))


if __name__ == "__main__":
    key = jax.random.PRNGKey(0)
    B, L = 2, 1024
    audio = jax.random.normal(key, (B, L), dtype=jnp.float32)

    # 1) default bf16 fast path, power=2 (looser tolerance: bf16 operands)
    n_fft, hop = 256, 128
    ref = _spec_reference(audio, n_fft, hop, 2)
    out_bf = jax.block_until_ready(
        spec_forward(audio, n_fft=n_fft, hop_length=hop, power=2))
    assert out_bf.shape == (B, n_fft // 2 + 1, (L - n_fft) // hop + 1)
    np.testing.assert_allclose(np.asarray(out_bf), np.asarray(ref),
                               rtol=5e-2, atol=1.0)

    # 2) f32 path, power=2 — tight tolerance
    out_f32 = jax.block_until_ready(
        spec_forward(audio, n_fft=n_fft, hop_length=hop, power=2,
                     compute_dtype=jnp.float32))
    np.testing.assert_allclose(np.asarray(out_f32), np.asarray(ref),
                               rtol=1e-4, atol=1e-3)

    # 3) forced frequency tiling (exercises the multi-freq-tile grid), f32
    out_ft = jax.block_until_ready(
        spec_forward(audio, n_fft=n_fft, hop_length=hop, power=2,
                     compute_dtype=jnp.float32, freq_tiles=2))
    np.testing.assert_allclose(np.asarray(out_ft), np.asarray(ref),
                               rtol=1e-4, atol=1e-3)

    # 4) power=1, n_fft not a multiple of 256 (symmetric-pad path), f32
    n_fft2, hop2 = 128, 64
    out2 = jax.block_until_ready(
        spec_forward(audio, n_fft=n_fft2, hop_length=hop2, power=1,
                     compute_dtype=jnp.float32))
    ref2 = _spec_reference(audio, n_fft2, hop2, 1)
    np.testing.assert_allclose(np.asarray(out2), np.asarray(ref2),
                               rtol=1e-4, atol=1e-3)

    print("KERNEL_OK")
</pallas_src>

<mosaic_0001>
module attributes {stable_mosaic.version = 11 : i64} {
  func.func @_spec_kernel(%arg0: i32, %arg1: i32, %arg2: memref<16x256xbf16, #tpu.memory_space<vmem>>, %arg3: memref<256x384xbf16, #tpu.memory_space<vmem>>, %arg4: memref<16x256xf32, #tpu.memory_space<vmem>>) attributes {dimension_semantics = [#tpu.dimension_semantics<parallel>, #tpu.dimension_semantics<parallel>], iteration_bounds = array<i64: 1, 1>, scalar_prefetch = 0 : i64, scratch_operands = 0 : i64, tpu.core_type = #tpu.core_type<tc>, window_params = [{transform_indices = @transform_0, window_bounds = array<i64: 16, 256>}, {pipeline_mode = #tpu.pipeline_mode<synchronous>, transform_indices = @transform_1, window_bounds = array<i64: 256, 384>}, {transform_indices = @transform_2, window_bounds = array<i64: 16, 256>}]} {
    %c0 = arith.constant 0 : index
    %c0_0 = arith.constant 0 : index
    %0 = vector.load %arg2[%c0, %c0_0] : memref<16x256xbf16, #tpu.memory_space<vmem>>, vector<16x256xbf16>
    %c0_1 = arith.constant 0 : index
    %c0_2 = arith.constant 0 : index
    %1 = vector.load %arg3[%c0_1, %c0_2] : memref<256x384xbf16, #tpu.memory_space<vmem>>, vector<256x384xbf16>
    %cst = arith.constant dense<0.000000e+00> : vector<16x384xf32>
    %2 = tpu.matmul %0, %1, %cst {dimension_numbers = #tpu.dot_dimension_numbers<[1], [0], [0], [1], [0, 0, 1, 1], [], []>} : vector<16x256xbf16>, vector<256x384xbf16>, vector<16x384xf32> -> vector<16x384xf32>
    %3 = vector.extract_strided_slice %2 {offsets = [0, 0], sizes = [16, 256], strides = [1, 1]} : vector<16x384xf32> to vector<16x256xf32>
    %4 = vector.extract_strided_slice %2 {offsets = [0, 256], sizes = [16, 128], strides = [1, 1]} : vector<16x384xf32> to vector<16x128xf32>
    %5 = vector.extract_strided_slice %3 {offsets = [0, 0], sizes = [16, 128], strides = [1, 1]} : vector<16x256xf32> to vector<16x128xf32>
    %6 = vector.extract_strided_slice %3 {offsets = [0, 0], sizes = [16, 128], strides = [1, 1]} : vector<16x256xf32> to vector<16x128xf32>
    %7 = arith.mulf %5, %6 : vector<16x128xf32>
    %8 = arith.mulf %4, %4 : vector<16x128xf32>
    %9 = arith.addf %7, %8 : vector<16x128xf32>
    %c0_3 = arith.constant 0 : index
    %c0_4 = arith.constant 0 : index
    %10 = vector.load %arg4[%c0_3, %c0_4] : memref<16x256xf32, #tpu.memory_space<vmem>>, vector<16x128xf32>
    tpu.vector_store %arg4[%c0_3, %c0_4], %9 {strides = array<i32>} : memref<16x256xf32, #tpu.memory_space<vmem>>, vector<16x128xf32>,
    %11 = vector.extract_strided_slice %3 {offsets = [0, 128], sizes = [16, 128], strides = [1, 1]} : vector<16x256xf32> to vector<16x128xf32>
    %12 = vector.extract_strided_slice %3 {offsets = [0, 128], sizes = [16, 128], strides = [1, 1]} : vector<16x256xf32> to vector<16x128xf32>
    %13 = arith.mulf %11, %12 : vector<16x128xf32>
    %c0_5 = arith.constant 0 : index
    %c128 = arith.constant 128 : index
    %14 = vector.load %arg4[%c0_5, %c128] : memref<16x256xf32, #tpu.memory_space<vmem>>, vector<16x128xf32>
    tpu.vector_store %arg4[%c0_5, %c128], %13 {strides = array<i32>} : memref<16x256xf32, #tpu.memory_space<vmem>>, vector<16x128xf32>,
    return
  }
  func.func @transform_0(%arg0: i32, %arg1: i32) -> (i32, i32) {
    %c0_i32 = arith.constant 0 : i32
    %c0_i32_0 = arith.constant 0 : i32
    return %arg1, %c0_i32 : i32, i32
  }
  func.func @transform_1(%arg0: i32, %arg1: i32) -> (i32, i32) {
    %c0_i32 = arith.constant 0 : i32
    %c0_i32_0 = arith.constant 0 : i32
    return %c0_i32, %arg0 : i32, i32
  }
  func.func @transform_2(%arg0: i32, %arg1: i32) -> (i32, i32) {
    %c0_i32 = arith.constant 0 : i32
    return %arg1, %arg0 : i32, i32
  }
}

</mosaic_0001>

<bundles_post_ra>
// kernel: tpu_custom_call.1
= control target key start
LH: loop header
LB: loop body
LE: loop exit
PB: predicated region body
PF: predicated region fallthrough
CT: control target
= control target key end

     0   :  { %7 = vsyncpa [#allocation3], 0  ;;  %s767_s0 = inlined_call_operand.hbm [shape: bf16[16,256], index: 0, kind: input, shape index: {}]   ;;  %s768_s1 = inlined_call_operand.hbm [shape: bf16[256,384], index: 1, kind: input, shape index: {}]   ;;  %s769_s2 = inlined_call_operand.hbm [shape: f32[16,256], index: 2, kind: output, shape index: {}]  }
   0x1   :  { %8 = vsyncpa [#allocation6], 0 }
   0x2   :  { %9 = vsyncpa [#allocation4], 0  ;;  %s707_s9 = smov [#allocation2]   ;;  %s635_s13 = scalar_lea.hbm %s767_s0, 256 }
   0x3   :  { %s15_s10 = sshll.u32 %s707_s9, 4  ;;  %p636_p0 = scmp.ne.s32.totalorder %s767_s0, %s635_s13  ;;  %s16_s10 = int_to_ptr.vmem [resolvable:$true] %s15_s10 }
   0x4   :  { %p639_p1 = scmp.lt.u32.totalorder %s635_s13, %s767_s0 }
   0x6   :  { %p641_p2 = pnand %p639_p1, %p636_p0 }
   0x8   :  { %644 = shalt.err (!%p641_p2)
}
   0x9   :  { %s645_s18 = scalar_lea.vmem %s16_s10, 256  ;;  %p650_p4 = scmp.lt.s32.totalorder %s16_s10, %s16_s10 }
   0xa   :  { %p646_p3 = scmp.ne.s32.totalorder %s16_s10, %s645_s18  ;;  %p651_p5 = scmp.lt.s32.totalorder %s645_s18, %s645_s18 }
   0xc   :  { %p652_p6 = por %p651_p5, %p650_p4 }
   0xe   :  { %p653_p7 = pnand %p652_p6, %p646_p3 }
  0x10   :  { %656 = shalt.err (!%p653_p7)
}
  0x11   :  { %s708_s19 = smov 128   ;;  %s709_s20 = smov 8  }
  0x12   :  { %21 = dma.hbm_to_vmem [thread:$0]  %s767_s0, 256, %s16_s10, [#allocation3], %s708_s19, %s708_s19, %s709_s20  }
  0x13   :  { %s710_s23 = smov [#allocation5]   ;;  %s657_s27 = scalar_lea.hbm %s768_s1, 6144 }
  0x14   :  { %s27_s24 = sshll.u32 %s710_s23, 4  ;;  %p658_p8 = scmp.ne.s32.totalorder %s768_s1, %s657_s27  ;;  %s28_s24 = int_to_ptr.vmem [resolvable:$true] %s27_s24 }
  0x15   :  { %p661_p9 = scmp.lt.u32.totalorder %s657_s27, %s768_s1 }
  0x17   :  { %p663_p10 = pnand %p661_p9, %p658_p8 }
  0x19   :  { %666 = shalt.err (!%p663_p10)
}
  0x1a   :  { %s667_s4 = scalar_lea.vmem %s28_s24, 6144  ;;  %p672_p12 = scmp.lt.s32.totalorder %s28_s24, %s28_s24 }
  0x1b   :  { %p668_p11 = scmp.ne.s32.totalorder %s28_s24, %s667_s4  ;;  %p673_p13 = scmp.lt.s32.totalorder %s667_s4, %s667_s4 }
  0x1d   :  { %p674_p0 = por %p673_p13, %p672_p12 }
  0x1f   :  { %p675_p1 = pnand %p674_p0, %p668_p11 }
  0x21   :  { %678 = shalt.err (!%p675_p1)
}
  0x22   :  { %s711_s0 = smov 192   ;;  %s712_s5 = smov 12  }
  0x23   :  { %33 = dma.hbm_to_vmem [thread:$0]  %s768_s1, 6144, %s28_s24, [#allocation6], %s711_s0, %s711_s0, %s712_s5  }
  0x24   :  { %701 = dma.done.wait [#allocation3], 256  }
  0x25   :  { %702 = vsyncadd [#allocation3], 4294967040 }
  0x26   :  { %703 = dma.done.wait [#allocation6], 6144  }
  0x27   :  { %704 = vsyncadd [#allocation6], 4294961152  ;;  %v568_v0 = vld [vmem:[#allocation5 + $0x4] ss:$12 sps:$4 sm:$0xff]   ;;  %v570_v1 = vld [vmem:[#allocation5] ss:$12 sps:$4 sm:$0xff]  }
  0x28   :  { %373 = vmatprep.subr.bf16.mxu0 %v568_v0  ;;  %v571_v2 = vld [vmem:[#allocation5 + $0x1c] ss:$12 sps:$4 sm:$0xff]   ;;  %v573_v3 = vld [vmem:[#allocation5 + $0x18] ss:$12 sps:$4 sm:$0xff]   ;;  %v574_v4 = vld [vmem:[#allocation5 + $0x34] ss:$12 sps:$4 sm:$0xff]  }
  0x29   :  { %374 = vmatpush1.bf16.msra.mxu0 %v570_v1  ;;  %v576_v5 = vld [vmem:[#allocation5 + $0x30] ss:$12 sps:$4 sm:$0xff]   ;;  %v577_v6 = vld [vmem:[#allocation5 + $0x4c] ss:$12 sps:$4 sm:$0xff]   ;;  %v579_v7 = vld [vmem:[#allocation5 + $0x48] ss:$12 sps:$4 sm:$0xff]  }
  0x2a   :  { %375 = vmatprep.subr.bf16.mxu0 %v571_v2  ;;  %v589_v8 = vld [vmem:[#allocation5 + $0xc8] ss:$12 sps:$4 sm:$0xff]   ;;  %v580_v10 = vld [vmem:[#allocation5 + $0x64] ss:$12 sps:$4 sm:$0xff]   ;;  %v594_v11 = vld [vmem:[#allocation5 + $0xe0] ss:$12 sps:$4 sm:$0xff]  }
  0x2b   :  { %v590_v9 = vld [vmem:[#allocation5 + $0x8] ss:$12 sps:$4 sm:$0xff]   ;;  %537 = vmatprep.subr.bf16.mxu1 %v589_v8  ;;  %v595_v12 = vld [vmem:[#allocation5 + $0x20] ss:$12 sps:$4 sm:$0xff]   ;;  %v599_v15 = vld [vmem:[#allocation5 + $0xf8] ss:$12 sps:$4 sm:$0xff]  }
  0x2c   :  { %538 = vmatpush3.bf16.msra.mxu1 %v590_v9  ;;  %v582_v13 = vld [vmem:[#allocation5 + $0x60] ss:$12 sps:$4 sm:$0xff]   ;;  %v583_v14 = vld [vmem:[#allocation5 + $0x7c] ss:$12 sps:$4 sm:$0xff]   ;;  %v600_v16 = vld [vmem:[#allocation5 + $0x38] ss:$12 sps:$4 sm:$0xff]  }
  0x2d   :  { %376 = vmatpush1.bf16.msra.mxu0 %v573_v3  ;;  %539 = vmatprep.subr.bf16.mxu1 %v594_v11  ;;  %v585_v17 = vld [vmem:[#allocation5 + $0x78] ss:$12 sps:$4 sm:$0xff]   ;;  %v586_v18 = vld [vmem:[#allocation5 + $0x94] ss:$12 sps:$4 sm:$0xff]   ;;  %v604_v19 = vld [vmem:[#allocation5 + $0x110] ss:$12 sps:$4 sm:$0xff]  }
  0x2e   :  { %377 = vmatprep.subr.bf16.mxu0 %v574_v4  ;;  %v605_v20 = vld [vmem:[#allocation5 + $0x50] ss:$12 sps:$4 sm:$0xff]   ;;  %v609_v22 = vld [vmem:[#allocation5 + $0x128] ss:$12 sps:$4 sm:$0xff]   ;;  %v591_v23 = vld [vmem:[#allocation5 + $0xac] ss:$12 sps:$4 sm:$0xff]  }
  0x2f   :  { %v588_v21 = vld [vmem:[#allocation5 + $0x90] ss:$12 sps:$4 sm:$0xff]   ;;  %v610_v24 = vld [vmem:[#allocation5 + $0x68] ss:$12 sps:$4 sm:$0xff]   ;;  %v614_v25 = vld [vmem:[#allocation5 + $0x140] ss:$12 sps:$4 sm:$0xff]  }
  0x30   :  { %540 = vmatpush3.bf16.msra.mxu1 %v595_v12  ;;  %v593_v26 = vld [vmem:[#allocation5 + $0xa8] ss:$12 sps:$4 sm:$0xff]   ;;  %v596_v27 = vld [vmem:[#allocation5 + $0xc4] ss:$12 sps:$4 sm:$0xff]   ;;  %v615_v28 = vld [vmem:[#allocation5 + $0x80] ss:$12 sps:$4 sm:$0xff]  }
  0x31   :  { %378 = vmatpush1.bf16.msra.mxu0 %v576_v5  ;;  %541 = vmatprep.subr.bf16.mxu1 %v599_v15  ;;  %v619_v29 = vld [vmem:[#allocation5 + $0x158] ss:$12 sps:$4 sm:$0xff]   ;;  %v598_v30 = vld [vmem:[#allocation5 + $0xc0] ss:$12 sps:$4 sm:$0xff]   ;;  %v601_v31 = vld [vmem:[#allocation5 + $0xdc] ss:$12 sps:$4 sm:$0xff]  }
  0x32   :  { %379 = vmatprep.subr.bf16.mxu0 %v577_v6  ;;  %v620_v32 = vld [vmem:[#allocation5 + $0x98] ss:$12 sps:$4 sm:$0xff]   ;;  %v624_v33 = vld [vmem:[#allocation5 + $0x170] ss:$12 sps:$4 sm:$0xff]   ;;  %v606_v35 = vld [vmem:[#allocation5 + $0xf4] ss:$12 sps:$4 sm:$0xff]  }
  0x33   :  { %v603_v34 = vld [vmem:[#allocation5 + $0xd8] ss:$12 sps:$4 sm:$0xff]   ;;  %v625_v36 = vld [vmem:[#allocation5 + $0xb0] ss:$12 sps:$4 sm:$0xff]   ;;  %v613_v41 = vld [vmem:[#allocation5 + $0x108] ss:$12 sps:$4 sm:$0xff]  }
  0x34   :  { %542 = vmatpush3.bf16.msra.mxu1 %v600_v16  ;;  %v631_v37 = vld [vmem:[#allocation2 + $0x4] ss:$8 sps:$4 sm:$0xff]   ;;  %v611_v39 = vld [vmem:[#allocation5 + $0x10c] ss:$12 sps:$4 sm:$0xff]   ;;  %v616_v42 = vld [vmem:[#allocation5 + $0x124] ss:$12 sps:$4 sm:$0xff]  }
  0x35   :  { %380 = vmatpush1.bf16.msra.mxu0 %v579_v7  ;;  %543 = vmatprep.subr.bf16.mxu1 %v604_v19  ;;  %v608_v38 = vld [vmem:[#allocation5 + $0xf0] ss:$12 sps:$4 sm:$0xff]   ;;  %v618_v43 = vld [vmem:[#allocation5 + $0x120] ss:$12 sps:$4 sm:$0xff]   ;;  %v623_v45 = vld [vmem:[#allocation5 + $0x138] ss:$12 sps:$4 sm:$0xff]  }
  0x36   :  { %381 = vmatprep.subr.bf16.mxu0 %v580_v10  ;;  %448 = vmatprep.mubr.bf16.mxu1 %v631_v37  ;;  %v629_v40 = vld [vmem:[#allocation2] ss:$8 sps:$4 sm:$0xff]   ;;  %v621_v44 = vld [vmem:[#allocation5 + $0x13c] ss:$12 sps:$4 sm:$0xff]   ;;  %v626_v46 = vld [vmem:[#allocation5 + $0x154] ss:$12 sps:$4 sm:$0xff]  }
  0x37   :  { %405 = vmatprep.mubr.bf16.mxu0 %v631_v37  ;;  %v628_v47 = vld [vmem:[#allocation5 + $0x150] ss:$12 sps:$4 sm:$0xff]   ;;  %v632_v48 = vld [vmem:[#allocation5 + $0x16c] ss:$12 sps:$4 sm:$0xff]   ;;  %v634_v49 = vld [vmem:[#allocation5 + $0x168] ss:$12 sps:$4 sm:$0xff]  }
  0x38   :  { %544 = vmatpush3.bf16.msra.mxu1 %v605_v20  ;;  %s713_s1 = smov [#allocation7]  }
  0x39   :  { %382 = vmatpush1.bf16.msra.mxu0 %v582_v13  ;;  %545 = vmatprep.subr.bf16.mxu1 %v609_v22  ;;  %s474_s8 = sshll.u32 %s713_s1, 4  ;;  %s475_s8 = int_to_ptr.vmem [resolvable:$true] %s474_s8 }
  0x3a   :  { %383 = vmatprep.subr.bf16.mxu0 %v583_v14  ;;  %s679_s9 = scalar_lea.vmem %s475_s8, 512  ;;  %p684_p3 = scmp.lt.s32.totalorder %s475_s8, %s475_s8 }
  0x3b   :  { %p680_p2 = scmp.ne.s32.totalorder %s475_s8, %s679_s9  ;;  %p685_p4 = scmp.lt.s32.totalorder %s679_s9, %s679_s9 }
  0x3c   :  { %546 = vmatpush3.bf16.msra.mxu1 %v610_v24 }
  0x3d   :  { %384 = vmatpush1.bf16.msra.mxu0 %v585_v17  ;;  %547 = vmatprep.subr.bf16.mxu1 %v614_v25  ;;  %p686_p5 = por %p685_p4, %p684_p3 }
  0x3e   :  { %385 = vmatprep.subr.bf16.mxu0 %v586_v18 }
  0x3f   :  { %p687_p6 = pnand %p686_p5, %p680_p2 }
  0x40   :  { %548 = vmatpush3.bf16.msra.mxu1 %v615_v28 }
  0x41   :  { %386 = vmatpush1.bf16.msra.mxu0 %v588_v21  ;;  %549 = vmatprep.subr.bf16.mxu1 %v619_v29 }
  0x42   :  { %387 = vmatprep.subr.bf16.mxu0 %v591_v23 }
  0x44   :  { %550 = vmatpush3.bf16.msra.mxu1 %v620_v32 }
  0x45   :  { %388 = vmatpush1.bf16.msra.mxu0 %v593_v26  ;;  %551 = vmatprep.subr.bf16.mxu1 %v624_v33 }
  0x46   :  { %389 = vmatprep.subr.bf16.mxu0 %v596_v27 }
  0x48   :  { %552 = vmatpush3.bf16.msra.mxu1 %v625_v36 }
  0x49   :  { %390 = vmatpush1.bf16.msra.mxu0 %v598_v30 }
  0x4a   :  { %391 = vmatprep.subr.bf16.mxu0 %v601_v31 }
  0x4b   :  { %449 = vmatmul.mubr.bf16.vlgmr.msra.gmra.mrb[0].mxu1 %v629_v40 }
  0x4d   :  { %392 = vmatpush1.bf16.msra.mxu0 %v603_v34 }
  0x4e   :  { %393 = vmatprep.subr.bf16.mxu0 %v606_v35 }
  0x51   :  { %394 = vmatpush1.bf16.msra.mxu0 %v608_v38 }
  0x52   :  { %395 = vmatprep.subr.bf16.mxu0 %v611_v39 }
  0x55   :  { %396 = vmatpush1.bf16.msra.mxu0 %v613_v41 }
  0x56   :  { %397 = vmatprep.subr.bf16.mxu0 %v616_v42 }
  0x59   :  { %398 = vmatpush1.bf16.msra.mxu0 %v618_v43 }
  0x5a   :  { %399 = vmatprep.subr.bf16.mxu0 %v621_v44 }
  0x5d   :  { %400 = vmatpush1.bf16.msra.mxu0 %v623_v45 }
  0x5e   :  { %401 = vmatprep.subr.bf16.mxu0 %v626_v46 }
  0x61   :  { %402 = vmatpush1.bf16.msra.mxu0 %v628_v47 }
  0x62   :  { %403 = vmatprep.subr.bf16.mxu0 %v632_v48 }
  0x65   :  { %404 = vmatpush1.bf16.msra.mxu0 %v634_v49 }
  0x68   :  { %406 = vmatmul.mubr.bf16.vlgmr.msra.gmra.mrb[0].mxu0 %v629_v40 }
 0x11e   :  { %v553_v50 = vpop.f32.mrb[0].mxu1 }
 0x11f   :  { %v554_v51 = vpop.f32.mrb[1].mxu1 }
 0x120   :  { %v555_v52 = vadd.f32 %v554_v51, %v553_v50  ;;  %v556_v53 = vpop.f32.mrb[2].mxu1 }
 0x121   :  { %v557_v54 = vpop.f32.mrb[3].mxu1 }
 0x122   :  { %v558_v55 = vadd.f32 %v557_v54, %v556_v53  ;;  %v459_v56 = vmul.f32 %v555_v52, %v555_v52 }
 0x124   :  { %v460_v62 = vmul.f32 %v558_v55, %v558_v55 }
 0x13b   :  { %v407_v57 = vpop.f32.mrb[0].mxu0 }
 0x13c   :  { %v457_v58 = vmul.f32 %v407_v57, %v407_v57  ;;  %v409_v59 = vpop.f32.mrb[1].mxu0 }
 0x13d   :  { %v465_v60 = vmul.f32 %v409_v59, %v409_v59  ;;  %v411_v61 = vpop.f32.mrb[2].mxu0 }
 0x13e   :  { %v461_v63 = vadd.f32 %v459_v56, %v457_v58  ;;  %v458_v0 = vmul.f32 %v411_v61, %v411_v61  ;;  %v413_v1 = vpop.f32.mrb[3].mxu0 }
 0x13f   :  { %467 = vst [vmem:[#allocation7 + $0x8] sm:$0xff] %v465_v60  ;;  %v466_v2 = vmul.f32 %v413_v1, %v413_v1 }
 0x140   :  { %463 = vst [vmem:[#allocation7] sm:$0xff] %v461_v63  ;;  %v462_v3 = vadd.f32 %v460_v62, %v458_v0 }
 0x141   :  { %468 = vst [vmem:[#allocation7 + $0x18] sm:$0xff] %v466_v2 }
 0x142   :  { %464 = vst [vmem:[#allocation7 + $0x10] sm:$0xff] %v462_v3 }
 0x143   :  { %690 = shalt.err (!%p687_p6)
}
 0x144   :  { %s691_s12 = scalar_lea.hbm %s769_s2, 512 }
 0x145   :  { %p692_p7 = scmp.ne.s32.totalorder %s769_s2, %s691_s12  ;;  %p695_p8 = scmp.lt.u32.totalorder %s691_s12, %s769_s2 }
 0x147   :  { %p697_p9 = pnand %p695_p8, %p692_p7 }
 0x149   :  { %700 = shalt.err (!%p697_p9)
}
 0x14a   :  { %s714_s17 = smov 256   ;;  %s715_s18 = smov 16  }
 0x14b   :  { %480 = dma.vmem_to_hbm [thread:$0]  %s475_s8, 512, %s769_s2, [#allocation4], %s714_s17, %s714_s17, %s715_s18  }
 0x14c   :  { %705 = dma.done.wait [#allocation4], 512  }
 0x14d   :  { %706 = vsyncadd [#allocation4], 4294966784 }
 0x14e   :  { %484 = vsyncpa [#allocation3], 1 }
 0x14f   :  { %485 = vsyncpa [#allocation6], 1 }
 0x150   :  { %486 = vsyncpa [#allocation4], 1 }

</bundles_post_ra>
